<compile_context>
chip_gen: v6e
topology: v6e:2x2x1
jax: 0.10.0
libtpu: 0.0.40
codegen_flags: <defaults>
</compile_context>

<pallas_src>
import functools
import math

import jax
import jax.numpy as jnp
from jax.experimental import pallas as pl
from jax.experimental.pallas import tpu as pltpu


# -----------------------------------------------------------------------------
# Kernel: single invocation, whole problem resident in VMEM.
# -----------------------------------------------------------------------------
def transformer_encoder_kernel(
    x_ref,      # (B, S, H)   original input
    w_ref,      # (H, 5H)     [wqkv(H,3H) | wo(H,H) | seg(H,H)]  (pre-transposed)
    v_ref,      # (1, 6H)     [bqkv(3H) | bo(H) | ln1_w(H) | ln1_b(H)]
    s_ref,      # (3S, H)     [ln2_w(S,H) ; ln2_b(S,H) ; bff(S,H)]
    wff_ref,    # (S, S)      fused Conv1d pair  (conv2_w @ conv1_w)
    o_ref,      # (B, S, H)   output
):
    B, S, H = x_ref.shape
    eps = 1e-6

    w_slab = w_ref[...]
    wqkv = w_slab[:, : 3 * H]                      # (H, 3H)  scale folded into Q part
    wo = w_slab[:, 3 * H : 4 * H]                  # (H, H)
    seg = w_slab[:, 4 * H :]                       # (H, H)   block-diagonal head mask

    v_slab = v_ref[...]
    bqkv = v_slab[:, : 3 * H]                      # (1, 3H)
    bo = v_slab[:, 3 * H : 4 * H]                  # (1, H)
    ln1_w = v_slab[:, 4 * H : 5 * H]               # (1, H)
    ln1_b = v_slab[:, 5 * H :]                     # (1, H)

    s_slab = s_ref[...]
    ln2_w = s_slab[:S]                             # (S, H)   sublane-aligned splits (S=8)
    ln2_b = s_slab[S : 2 * S]
    bff = s_slab[2 * S :]
    wff = wff_ref[...]                             # (S, S)

    # ---- LayerNorm(H) over every (b, s) row, all at once ---------------------
    x = x_ref[...]
    mu = jnp.mean(x, axis=-1, keepdims=True)
    var = jnp.mean((x - mu) ** 2, axis=-1, keepdims=True)
    xln = (x - mu) * jax.lax.rsqrt(var + eps) * ln1_w + ln1_b          # (B, S, H)

    # ---- Fused Q/K/V projection: ONE (B*S,H)@(H,3H) MXU dot ------------------
    qkv = jnp.dot(xln.reshape(B * S, H), wqkv,
                  preferred_element_type=jnp.float32) + bqkv           # (B*S, 3H)
    # TODO(synk): at H >= 128 pad each of Q/K/V to a 128-lane boundary in the
    # fused weight so these splits fall on lane-tile edges (noise at H=32).
    q = qkv[:, :H].reshape(B, S, H)                # scale already folded in
    k = qkv[:, H : 2 * H].reshape(B, S, H)
    v = qkv[:, 2 * H :].reshape(B, S, H)

    # ---- Multihead self-attention over the B axis (batch_first=False) --------
    # Static unroll over the B attention targets: no grid-step overhead, no
    # recomputation of LN1 / K / V (computed once above).
    for a in range(B):
        prod = q[a][None, :, :] * k                                    # (B, S, H)
        # Per-head sums broadcast back to every lane of the head via one MXU
        # dot against the block-diagonal head mask.
        logits = jnp.dot(prod.reshape(B * S, H), seg,
                         preferred_element_type=jnp.float32).reshape(B, S, H)
        m = jnp.max(logits, axis=0)                                    # (S, H)
        e = jnp.exp(logits - m)                                        # (B, S, H)
        denom = jnp.sum(e, axis=0)                                     # (S, H)
        w_attn = e * pl.reciprocal(denom, approx=True)                 # (B, S, H)
        ctx = jnp.sum(w_attn * v, axis=0)                              # (S, H)

        # output projection
        attn = jnp.dot(ctx, wo, preferred_element_type=jnp.float32) + bo

        # residual with the ORIGINAL input (dropout p=0 is identity)
        res = attn + x[a]                                              # (S, H)

        # LayerNorm over (S, H) jointly (mean-of-means exact: equal groups)
        mu2 = jnp.mean(jnp.mean(res, axis=-1, keepdims=True), axis=0, keepdims=True)
        var2 = jnp.mean(jnp.mean((res - mu2) ** 2, axis=-1, keepdims=True),
                        axis=0, keepdims=True)
        rn = (res - mu2) * jax.lax.rsqrt(var2 + eps) * ln2_w + ln2_b

        # fused 1x1 convs: (conv2_w @ conv1_w) @ rn + (conv2_w @ conv1_b + conv2_b)
        ff = jnp.dot(wff, rn, preferred_element_type=jnp.float32) + bff
        o_ref[a] = ff + res
    # H=32 < 128 lanes ⇒ masked output stores; per review, not worth a relayout
    # at these sizes (revisit only if H grows to >=128).


# -----------------------------------------------------------------------------
# Wrapper: parameter packing (plain JAX, outside the kernel) + pallas_call
# -----------------------------------------------------------------------------
def transformer_encoder_forward(x, params, num_heads):
    B, S, H = x.shape
    hd = H // num_heads
    scale = 1.0 / math.sqrt(hd)

    w_in = params["in_proj_w"]                       # (3H, H) rows: [q; k; v]
    b_in = params["in_proj_b"]                       # (3H,)
    wq = w_in[:H].T * scale                          # fold 1/sqrt(hd) into Q weights
    wk = w_in[H : 2 * H].T
    wv = w_in[2 * H :].T
    bq = b_in[:H] * scale
    bk = b_in[H : 2 * H]
    bv = b_in[2 * H :]
    wqkv = jnp.concatenate([wq, wk, wv], axis=1)     # (H, 3H)
    bqkv = jnp.concatenate([bq, bk, bv])             # (3H,)

    wo = params["out_proj_w"].T                      # (H, H)
    bo = params["out_proj_b"]                        # (H,)

    head_id = jnp.arange(H, dtype=jnp.int32) // hd
    seg = (head_id[:, None] == head_id[None, :]).astype(jnp.float32)   # (H, H)

    # Packed slabs: fewer, larger DMAs at kernel start.
    w_slab = jnp.concatenate([wqkv, wo, seg], axis=1)                  # (H, 5H)
    v_slab = jnp.concatenate(
        [bqkv, bo, params["ln1_w"], params["ln1_b"]]).reshape(1, 6 * H)  # (1, 6H)

    # Fuse the two kernel_size=1 convs (no nonlinearity / dropout==0 between
    # them in the module), bias pre-broadcast lane-dense.
    wff = params["conv2_w"] @ params["conv1_w"]                        # (S, S)
    bff = params["conv2_w"] @ params["conv1_b"] + params["conv2_b"]    # (S,)
    bff = jnp.broadcast_to(bff[:, None], (S, H))
    s_slab = jnp.concatenate(
        [params["ln2_w"], params["ln2_b"], bff], axis=0).astype(jnp.float32)  # (3S, H)

    args = (x, w_slab, v_slab, s_slab, wff)

    return pl.pallas_call(
        transformer_encoder_kernel,
        out_shape=jax.ShapeDtypeStruct((B, S, H), jnp.float32),
        grid=(1,),   # single step: overhead-bound problem, one TC does it all
        in_specs=[pl.BlockSpec(t.shape, lambda i, n=t.ndim: (0,) * n) for t in args],
        out_specs=pl.BlockSpec((B, S, H), lambda i: (0, 0, 0)),
        compiler_params=pltpu.CompilerParams(dimension_semantics=("arbitrary",)),
    )(*args)


# -----------------------------------------------------------------------------
# Deterministic parameter init (shapes follow the PyTorch module __init__)
# -----------------------------------------------------------------------------
def init_params(key, seq_len, hidden_size, ff_dim):
    S, H, F = seq_len, hidden_size, ff_dim
    ks = jax.random.split(key, 10)
    n = lambda k, shape, s=0.05: s * jax.random.normal(k, shape, dtype=jnp.float32)
    return dict(
        ln1_w=1.0 + n(ks[0], (H,)),
        ln1_b=n(ks[1], (H,)),
        in_proj_w=n(ks[2], (3 * H, H)),
        in_proj_b=n(ks[3], (3 * H,)),
        out_proj_w=n(ks[4], (H, H)),
        out_proj_b=n(ks[5], (H,)),
        ln2_w=1.0 + n(ks[6], (S, H)),
        ln2_b=n(ks[7], (S, H)),
        conv1_w=n(ks[8], (F, S)),          # Conv1d weight (F, S, 1) squeezed
        conv1_b=jnp.zeros((F,), jnp.float32) + 0.01,
        conv2_w=n(ks[9], (S, F)),          # Conv1d weight (S, F, 1) squeezed
        conv2_b=jnp.zeros((S,), jnp.float32) - 0.01,
    )


# -----------------------------------------------------------------------------
# Pure-JAX reference (mirrors PyTorch semantics exactly, eps=1e-6 per module)
# -----------------------------------------------------------------------------
def reference_forward(x, p, num_heads):
    B, S, H = x.shape
    hd = H // num_heads
    eps = 1e-6

    mu = x.mean(-1, keepdims=True)
    var = ((x - mu) ** 2).mean(-1, keepdims=True)
    xln = (x - mu) / jnp.sqrt(var + eps) * p["ln1_w"] + p["ln1_b"]

    qkv = xln @ p["in_proj_w"].T + p["in_proj_b"]                 # (B, S, 3H)
    q, k, v = qkv[..., :H], qkv[..., H:2 * H], qkv[..., 2 * H:]
    q = q / math.sqrt(hd)
    qh = q.reshape(B, S, num_heads, hd)
    kh = k.reshape(B, S, num_heads, hd)
    vh = v.reshape(B, S, num_heads, hd)
    logits = jnp.einsum("ashd,bshd->shab", qh, kh)                # attn over B
    w = jax.nn.softmax(logits, axis=-1)
    ctx = jnp.einsum("shab,bshd->ashd", w, vh).reshape(B, S, H)
    attn = ctx @ p["out_proj_w"].T + p["out_proj_b"]

    res = attn + x

    mu2 = res.mean(axis=(1, 2), keepdims=True)
    var2 = ((res - mu2) ** 2).mean(axis=(1, 2), keepdims=True)
    rn = (res - mu2) / jnp.sqrt(var2 + eps) * p["ln2_w"] + p["ln2_b"]

    f1 = jnp.einsum("fs,bsh->bfh", p["conv1_w"], rn) + p["conv1_b"][None, :, None]
    f2 = jnp.einsum("sf,bfh->bsh", p["conv2_w"], f1) + p["conv2_b"][None, :, None]
    return f2 + res


if __name__ == "__main__":
    B, S, H, NUM_HEADS, FF = 2, 8, 32, 4, 16

    key = jax.random.PRNGKey(0)
    kx, kp = jax.random.split(key)
    x = jax.random.normal(kx, (B, S, H), dtype=jnp.float32)
    params = init_params(kp, S, H, FF)

    out = transformer_encoder_forward(x, params, NUM_HEADS)
    out = jax.block_until_ready(out)

    ref = jax.block_until_ready(reference_forward(x, params, NUM_HEADS))
    assert out.shape == (B, S, H)
    assert bool(jnp.allclose(out, ref, atol=1e-3, rtol=1e-3)), "mismatch vs reference"

    print("KERNEL_OK")
</pallas_src>

<mosaic_0001>
module attributes {stable_mosaic.version = 11 : i64} {
  func.func @transformer_encoder_kernel(%arg0: i32, %arg1: memref<2x8x32xf32, #tpu.memory_space<vmem>>, %arg2: memref<32x160xf32, #tpu.memory_space<vmem>>, %arg3: memref<1x192xf32, #tpu.memory_space<vmem>>, %arg4: memref<24x32xf32, #tpu.memory_space<vmem>>, %arg5: memref<8x8xf32, #tpu.memory_space<vmem>>, %arg6: memref<2x8x32xf32, #tpu.memory_space<vmem>>) attributes {dimension_semantics = [#tpu.dimension_semantics<arbitrary>], iteration_bounds = array<i64: 1>, scalar_prefetch = 0 : i64, scratch_operands = 0 : i64, tpu.core_type = #tpu.core_type<tc>, window_params = [{pipeline_mode = #tpu.pipeline_mode<synchronous>, transform_indices = @transform_0, window_bounds = array<i64: 2, 8, 32>}, {pipeline_mode = #tpu.pipeline_mode<synchronous>, transform_indices = @transform_1, window_bounds = array<i64: 32, 160>}, {pipeline_mode = #tpu.pipeline_mode<synchronous>, transform_indices = @transform_2, window_bounds = array<i64: 1, 192>}, {pipeline_mode = #tpu.pipeline_mode<synchronous>, transform_indices = @transform_3, window_bounds = array<i64: 24, 32>}, {pipeline_mode = #tpu.pipeline_mode<synchronous>, transform_indices = @transform_4, window_bounds = array<i64: 8, 8>}, {pipeline_mode = #tpu.pipeline_mode<synchronous>, transform_indices = @transform_5, window_bounds = array<i64: 2, 8, 32>}]} {
    %c0 = arith.constant 0 : index
    %c0_0 = arith.constant 0 : index
    %0 = vector.load %arg2[%c0, %c0_0] : memref<32x160xf32, #tpu.memory_space<vmem>>, vector<32x160xf32>
    %1 = vector.extract_strided_slice %0 {offsets = [0, 0], sizes = [32, 96], strides = [1, 1]} : vector<32x160xf32> to vector<32x96xf32>
    %2 = vector.extract_strided_slice %0 {offsets = [0, 96], sizes = [32, 32], strides = [1, 1]} : vector<32x160xf32> to vector<32x32xf32>
    %3 = vector.extract_strided_slice %0 {offsets = [0, 128], sizes = [32, 32], strides = [1, 1]} : vector<32x160xf32> to vector<32x32xf32>
    %c0_1 = arith.constant 0 : index
    %c0_2 = arith.constant 0 : index
    %4 = vector.load %arg3[%c0_1, %c0_2] : memref<1x192xf32, #tpu.memory_space<vmem>>, vector<1x192xf32>
    %5 = vector.extract_strided_slice %4 {offsets = [0, 0], sizes = [1, 96], strides = [1, 1]} : vector<1x192xf32> to vector<1x96xf32>
    %6 = vector.extract_strided_slice %4 {offsets = [0, 96], sizes = [1, 32], strides = [1, 1]} : vector<1x192xf32> to vector<1x32xf32>
    %7 = vector.extract_strided_slice %4 {offsets = [0, 128], sizes = [1, 32], strides = [1, 1]} : vector<1x192xf32> to vector<1x32xf32>
    %8 = vector.extract_strided_slice %4 {offsets = [0, 160], sizes = [1, 32], strides = [1, 1]} : vector<1x192xf32> to vector<1x32xf32>
    %c0_3 = arith.constant 0 : index
    %c0_4 = arith.constant 0 : index
    %9 = vector.load %arg4[%c0_3, %c0_4] : memref<24x32xf32, #tpu.memory_space<vmem>>, vector<24x32xf32>
    %10 = vector.extract_strided_slice %9 {offsets = [0, 0], sizes = [8, 32], strides = [1, 1]} : vector<24x32xf32> to vector<8x32xf32>
    %11 = vector.extract_strided_slice %9 {offsets = [8, 0], sizes = [8, 32], strides = [1, 1]} : vector<24x32xf32> to vector<8x32xf32>
    %12 = vector.extract_strided_slice %9 {offsets = [16, 0], sizes = [8, 32], strides = [1, 1]} : vector<24x32xf32> to vector<8x32xf32>
    %c0_5 = arith.constant 0 : index
    %c0_6 = arith.constant 0 : index
    %13 = vector.load %arg5[%c0_5, %c0_6] : memref<8x8xf32, #tpu.memory_space<vmem>>, vector<8x8xf32>
    %c0_7 = arith.constant 0 : index
    %c0_8 = arith.constant 0 : index
    %c0_9 = arith.constant 0 : index
    %14 = vector.load %arg1[%c0_7, %c0_8, %c0_9] : memref<2x8x32xf32, #tpu.memory_space<vmem>>, vector<2x8x32xf32>
    %cst = arith.constant dense<0.000000e+00> : vector<2x8xf32>
    %15 = vector.multi_reduction <add>, %14, %cst [2] : vector<2x8x32xf32> to vector<2x8xf32>
    %16 = vector.shape_cast %15 : vector<2x8xf32> to vector<2x8x1xf32>
    %cst_10 = arith.constant 3.200000e+01 : f32
    %17 = vector.broadcast %cst_10 : f32 to vector<2x8x1xf32>
    %18 = arith.divf %16, %17 : vector<2x8x1xf32>
    %19 = vector.broadcast %18 : vector<2x8x1xf32> to vector<2x8x32xf32>
    %20 = arith.subf %14, %19 : vector<2x8x32xf32>
    %21 = arith.mulf %20, %20 : vector<2x8x32xf32>
    %cst_11 = arith.constant dense<0.000000e+00> : vector<2x8xf32>
    %22 = vector.multi_reduction <add>, %21, %cst_11 [2] : vector<2x8x32xf32> to vector<2x8xf32>
    %23 = vector.shape_cast %22 : vector<2x8xf32> to vector<2x8x1xf32>
    %cst_12 = arith.constant 3.200000e+01 : f32
    %24 = vector.broadcast %cst_12 : f32 to vector<2x8x1xf32>
    %25 = arith.divf %23, %24 : vector<2x8x1xf32>
    %26 = vector.broadcast %18 : vector<2x8x1xf32> to vector<2x8x32xf32>
    %27 = arith.subf %14, %26 : vector<2x8x32xf32>
    %cst_13 = arith.constant 9.99999997E-7 : f32
    %28 = vector.broadcast %cst_13 : f32 to vector<2x8x1xf32>
    %29 = arith.addf %25, %28 : vector<2x8x1xf32>
    %30 = math.rsqrt %29 : vector<2x8x1xf32>
    %31 = vector.broadcast %30 : vector<2x8x1xf32> to vector<2x8x32xf32>
    %32 = arith.mulf %27, %31 : vector<2x8x32xf32>
    %33 = vector.shape_cast %7 : vector<1x32xf32> to vector<1x1x32xf32>
    %34 = vector.broadcast %33 : vector<1x1x32xf32> to vector<2x8x32xf32>
    %35 = arith.mulf %32, %34 : vector<2x8x32xf32>
    %36 = vector.shape_cast %8 : vector<1x32xf32> to vector<1x1x32xf32>
    %37 = vector.broadcast %36 : vector<1x1x32xf32> to vector<2x8x32xf32>
    %38 = arith.addf %35, %37 : vector<2x8x32xf32>
    %39 = vector.shape_cast %38 : vector<2x8x32xf32> to vector<16x32xf32>
    %cst_14 = arith.constant dense<0.000000e+00> : vector<16x96xf32>
    %40 = tpu.matmul %39, %1, %cst_14 {dimension_numbers = #tpu.dot_dimension_numbers<[1], [0], [0], [1], [0, 0, 1, 1], [], []>} : vector<16x32xf32>, vector<32x96xf32>, vector<16x96xf32> -> vector<16x96xf32>
    %41 = vector.broadcast %5 : vector<1x96xf32> to vector<16x96xf32>
    %42 = arith.addf %40, %41 : vector<16x96xf32>
    %43 = vector.extract_strided_slice %42 {offsets = [0, 0], sizes = [16, 32], strides = [1, 1]} : vector<16x96xf32> to vector<16x32xf32>
    %44 = vector.shape_cast %43 : vector<16x32xf32> to vector<2x8x32xf32>
    %45 = vector.extract_strided_slice %42 {offsets = [0, 32], sizes = [16, 32], strides = [1, 1]} : vector<16x96xf32> to vector<16x32xf32>
    %46 = vector.shape_cast %45 : vector<16x32xf32> to vector<2x8x32xf32>
    %47 = vector.extract_strided_slice %42 {offsets = [0, 64], sizes = [16, 32], strides = [1, 1]} : vector<16x96xf32> to vector<16x32xf32>
    %48 = vector.shape_cast %47 : vector<16x32xf32> to vector<2x8x32xf32>
    %49 = vector.extract_strided_slice %44 {offsets = [0, 0, 0], sizes = [1, 8, 32], strides = [1, 1, 1]} : vector<2x8x32xf32> to vector<1x8x32xf32>
    %50 = vector.shape_cast %49 : vector<1x8x32xf32> to vector<8x32xf32>
    %51 = vector.shape_cast %50 : vector<8x32xf32> to vector<1x8x32xf32>
    %52 = vector.broadcast %51 : vector<1x8x32xf32> to vector<2x8x32xf32>
    %53 = arith.mulf %52, %46 : vector<2x8x32xf32>
    %54 = vector.shape_cast %53 : vector<2x8x32xf32> to vector<16x32xf32>
    %cst_15 = arith.constant dense<0.000000e+00> : vector<16x32xf32>
    %55 = tpu.matmul %54, %3, %cst_15 {dimension_numbers = #tpu.dot_dimension_numbers<[1], [0], [0], [1], [0, 0, 1, 1], [], []>} : vector<16x32xf32>, vector<32x32xf32>, vector<16x32xf32> -> vector<16x32xf32>
    %56 = vector.shape_cast %55 : vector<16x32xf32> to vector<2x8x32xf32>
    %cst_16 = arith.constant dense<0xFF800000> : vector<8x32xf32>
    %57 = vector.multi_reduction <maximumf>, %56, %cst_16 [0] : vector<2x8x32xf32> to vector<8x32xf32>
    %58 = vector.shape_cast %57 : vector<8x32xf32> to vector<1x8x32xf32>
    %59 = vector.broadcast %58 : vector<1x8x32xf32> to vector<2x8x32xf32>
    %60 = arith.subf %56, %59 : vector<2x8x32xf32>
    %61 = math.exp %60 : vector<2x8x32xf32>
    %cst_17 = arith.constant dense<0.000000e+00> : vector<8x32xf32>
    %62 = vector.multi_reduction <add>, %61, %cst_17 [0] : vector<2x8x32xf32> to vector<8x32xf32>
    %63 = tpu.reciprocal %62 {approx = true} : vector<8x32xf32> -> vector<8x32xf32>
    %64 = vector.shape_cast %63 : vector<8x32xf32> to vector<1x8x32xf32>
    %65 = vector.broadcast %64 : vector<1x8x32xf32> to vector<2x8x32xf32>
    %66 = arith.mulf %61, %65 : vector<2x8x32xf32>
    %67 = arith.mulf %66, %48 : vector<2x8x32xf32>
    %cst_18 = arith.constant dense<0.000000e+00> : vector<8x32xf32>
    %68 = vector.multi_reduction <add>, %67, %cst_18 [0] : vector<2x8x32xf32> to vector<8x32xf32>
    %cst_19 = arith.constant dense<0.000000e+00> : vector<8x32xf32>
    %69 = tpu.matmul %68, %2, %cst_19 {dimension_numbers = #tpu.dot_dimension_numbers<[1], [0], [0], [1], [0, 0, 1, 1], [], []>} : vector<8x32xf32>, vector<32x32xf32>, vector<8x32xf32> -> vector<8x32xf32>
    %70 = vector.broadcast %6 : vector<1x32xf32> to vector<8x32xf32>
    %71 = arith.addf %69, %70 : vector<8x32xf32>
    %72 = vector.extract_strided_slice %14 {offsets = [0, 0, 0], sizes = [1, 8, 32], strides = [1, 1, 1]} : vector<2x8x32xf32> to vector<1x8x32xf32>
    %73 = vector.shape_cast %72 : vector<1x8x32xf32> to vector<8x32xf32>
    %74 = arith.addf %71, %73 : vector<8x32xf32>
    %cst_20 = arith.constant dense<0.000000e+00> : vector<8xf32>
    %75 = vector.multi_reduction <add>, %74, %cst_20 [1] : vector<8x32xf32> to vector<8xf32>
    %76 = vector.shape_cast %75 : vector<8xf32> to vector<8x1xf32>
    %cst_21 = arith.constant 3.200000e+01 : f32
    %77 = vector.broadcast %cst_21 : f32 to vector<8x1xf32>
    %78 = arith.divf %76, %77 : vector<8x1xf32>
    %cst_22 = arith.constant dense<0.000000e+00> : vector<1xf32>
    %79 = vector.multi_reduction <add>, %78, %cst_22 [0] : vector<8x1xf32> to vector<1xf32>
    %80 = vector.shape_cast %79 : vector<1xf32> to vector<1x1xf32>
    %cst_23 = arith.constant 8.000000e+00 : f32
    %81 = vector.broadcast %cst_23 : f32 to vector<1x1xf32>
    %82 = arith.divf %80, %81 : vector<1x1xf32>
    %83 = vector.broadcast %82 : vector<1x1xf32> to vector<8x32xf32>
    %84 = arith.subf %74, %83 : vector<8x32xf32>
    %85 = arith.mulf %84, %84 : vector<8x32xf32>
    %cst_24 = arith.constant dense<0.000000e+00> : vector<8xf32>
    %86 = vector.multi_reduction <add>, %85, %cst_24 [1] : vector<8x32xf32> to vector<8xf32>
    %87 = vector.shape_cast %86 : vector<8xf32> to vector<8x1xf32>
    %cst_25 = arith.constant 3.200000e+01 : f32
    %88 = vector.broadcast %cst_25 : f32 to vector<8x1xf32>
    %89 = arith.divf %87, %88 : vector<8x1xf32>
    %cst_26 = arith.constant dense<0.000000e+00> : vector<1xf32>
    %90 = vector.multi_reduction <add>, %89, %cst_26 [0] : vector<8x1xf32> to vector<1xf32>
    %91 = vector.shape_cast %90 : vector<1xf32> to vector<1x1xf32>
    %cst_27 = arith.constant 8.000000e+00 : f32
    %92 = vector.broadcast %cst_27 : f32 to vector<1x1xf32>
    %93 = arith.divf %91, %92 : vector<1x1xf32>
    %94 = vector.broadcast %82 : vector<1x1xf32> to vector<8x32xf32>
    %95 = arith.subf %74, %94 : vector<8x32xf32>
    %cst_28 = arith.constant 9.99999997E-7 : f32
    %96 = vector.broadcast %cst_28 : f32 to vector<1x1xf32>
    %97 = arith.addf %93, %96 : vector<1x1xf32>
    %98 = math.rsqrt %97 : vector<1x1xf32>
    %99 = vector.broadcast %98 : vector<1x1xf32> to vector<8x32xf32>
    %100 = arith.mulf %95, %99 : vector<8x32xf32>
    %101 = arith.mulf %100, %10 : vector<8x32xf32>
    %102 = arith.addf %101, %11 : vector<8x32xf32>
    %cst_29 = arith.constant dense<0.000000e+00> : vector<8x32xf32>
    %103 = tpu.matmul %13, %102, %cst_29 {dimension_numbers = #tpu.dot_dimension_numbers<[1], [0], [0], [1], [0, 0, 1, 1], [], []>} : vector<8x8xf32>, vector<8x32xf32>, vector<8x32xf32> -> vector<8x32xf32>
    %104 = arith.addf %103, %12 : vector<8x32xf32>
    %105 = arith.addf %104, %74 : vector<8x32xf32>
    %c0_30 = arith.constant 0 : index
    %c0_31 = arith.constant 0 : index
    %c0_32 = arith.constant 0 : index
    %106 = vector.load %arg6[%c0_30, %c0_31, %c0_32] : memref<2x8x32xf32, #tpu.memory_space<vmem>>, vector<1x8x32xf32>
    %107 = vector.shape_cast %106 : vector<1x8x32xf32> to vector<8x32xf32>
    %108 = vector.shape_cast %105 : vector<8x32xf32> to vector<1x8x32xf32>
    tpu.vector_store %arg6[%c0_30, %c0_31, %c0_32], %108 {strides = array<i32>} : memref<2x8x32xf32, #tpu.memory_space<vmem>>, vector<1x8x32xf32>,
    %109 = vector.extract_strided_slice %44 {offsets = [1, 0, 0], sizes = [1, 8, 32], strides = [1, 1, 1]} : vector<2x8x32xf32> to vector<1x8x32xf32>
    %110 = vector.shape_cast %109 : vector<1x8x32xf32> to vector<8x32xf32>
    %111 = vector.shape_cast %110 : vector<8x32xf32> to vector<1x8x32xf32>
    %112 = vector.broadcast %111 : vector<1x8x32xf32> to vector<2x8x32xf32>
    %113 = arith.mulf %112, %46 : vector<2x8x32xf32>
    %114 = vector.shape_cast %113 : vector<2x8x32xf32> to vector<16x32xf32>
    %cst_33 = arith.constant dense<0.000000e+00> : vector<16x32xf32>
    %115 = tpu.matmul %114, %3, %cst_33 {dimension_numbers = #tpu.dot_dimension_numbers<[1], [0], [0], [1], [0, 0, 1, 1], [], []>} : vector<16x32xf32>, vector<32x32xf32>, vector<16x32xf32> -> vector<16x32xf32>
    %116 = vector.shape_cast %115 : vector<16x32xf32> to vector<2x8x32xf32>
    %cst_34 = arith.constant dense<0xFF800000> : vector<8x32xf32>
    %117 = vector.multi_reduction <maximumf>, %116, %cst_34 [0] : vector<2x8x32xf32> to vector<8x32xf32>
    %118 = vector.shape_cast %117 : vector<8x32xf32> to vector<1x8x32xf32>
    %119 = vector.broadcast %118 : vector<1x8x32xf32> to vector<2x8x32xf32>
    %120 = arith.subf %116, %119 : vector<2x8x32xf32>
    %121 = math.exp %120 : vector<2x8x32xf32>
    %cst_35 = arith.constant dense<0.000000e+00> : vector<8x32xf32>
    %122 = vector.multi_reduction <add>, %121, %cst_35 [0] : vector<2x8x32xf32> to vector<8x32xf32>
    %123 = tpu.reciprocal %122 {approx = true} : vector<8x32xf32> -> vector<8x32xf32>
    %124 = vector.shape_cast %123 : vector<8x32xf32> to vector<1x8x32xf32>
    %125 = vector.broadcast %124 : vector<1x8x32xf32> to vector<2x8x32xf32>
    %126 = arith.mulf %121, %125 : vector<2x8x32xf32>
    %127 = arith.mulf %126, %48 : vector<2x8x32xf32>
    %cst_36 = arith.constant dense<0.000000e+00> : vector<8x32xf32>
    %128 = vector.multi_reduction <add>, %127, %cst_36 [0] : vector<2x8x32xf32> to vector<8x32xf32>
    %cst_37 = arith.constant dense<0.000000e+00> : vector<8x32xf32>
    %129 = tpu.matmul %128, %2, %cst_37 {dimension_numbers = #tpu.dot_dimension_numbers<[1], [0], [0], [1], [0, 0, 1, 1], [], []>} : vector<8x32xf32>, vector<32x32xf32>, vector<8x32xf32> -> vector<8x32xf32>
    %130 = vector.broadcast %6 : vector<1x32xf32> to vector<8x32xf32>
    %131 = arith.addf %129, %130 : vector<8x32xf32>
    %132 = vector.extract_strided_slice %14 {offsets = [1, 0, 0], sizes = [1, 8, 32], strides = [1, 1, 1]} : vector<2x8x32xf32> to vector<1x8x32xf32>
    %133 = vector.shape_cast %132 : vector<1x8x32xf32> to vector<8x32xf32>
    %134 = arith.addf %131, %133 : vector<8x32xf32>
    %cst_38 = arith.constant dense<0.000000e+00> : vector<8xf32>
    %135 = vector.multi_reduction <add>, %134, %cst_38 [1] : vector<8x32xf32> to vector<8xf32>
    %136 = vector.shape_cast %135 : vector<8xf32> to vector<8x1xf32>
    %cst_39 = arith.constant 3.200000e+01 : f32
    %137 = vector.broadcast %cst_39 : f32 to vector<8x1xf32>
    %138 = arith.divf %136, %137 : vector<8x1xf32>
    %cst_40 = arith.constant dense<0.000000e+00> : vector<1xf32>
    %139 = vector.multi_reduction <add>, %138, %cst_40 [0] : vector<8x1xf32> to vector<1xf32>
    %140 = vector.shape_cast %139 : vector<1xf32> to vector<1x1xf32>
    %cst_41 = arith.constant 8.000000e+00 : f32
    %141 = vector.broadcast %cst_41 : f32 to vector<1x1xf32>
    %142 = arith.divf %140, %141 : vector<1x1xf32>
    %143 = vector.broadcast %142 : vector<1x1xf32> to vector<8x32xf32>
    %144 = arith.subf %134, %143 : vector<8x32xf32>
    %145 = arith.mulf %144, %144 : vector<8x32xf32>
    %cst_42 = arith.constant dense<0.000000e+00> : vector<8xf32>
    %146 = vector.multi_reduction <add>, %145, %cst_42 [1] : vector<8x32xf32> to vector<8xf32>
    %147 = vector.shape_cast %146 : vector<8xf32> to vector<8x1xf32>
    %cst_43 = arith.constant 3.200000e+01 : f32
    %148 = vector.broadcast %cst_43 : f32 to vector<8x1xf32>
    %149 = arith.divf %147, %148 : vector<8x1xf32>
    %cst_44 = arith.constant dense<0.000000e+00> : vector<1xf32>
    %150 = vector.multi_reduction <add>, %149, %cst_44 [0] : vector<8x1xf32> to vector<1xf32>
    %151 = vector.shape_cast %150 : vector<1xf32> to vector<1x1xf32>
    %cst_45 = arith.constant 8.000000e+00 : f32
    %152 = vector.broadcast %cst_45 : f32 to vector<1x1xf32>
    %153 = arith.divf %151, %152 : vector<1x1xf32>
    %154 = vector.broadcast %142 : vector<1x1xf32> to vector<8x32xf32>
    %155 = arith.subf %134, %154 : vector<8x32xf32>
    %cst_46 = arith.constant 9.99999997E-7 : f32
    %156 = vector.broadcast %cst_46 : f32 to vector<1x1xf32>
    %157 = arith.addf %153, %156 : vector<1x1xf32>
    %158 = math.rsqrt %157 : vector<1x1xf32>
    %159 = vector.broadcast %158 : vector<1x1xf32> to vector<8x32xf32>
    %160 = arith.mulf %155, %159 : vector<8x32xf32>
    %161 = arith.mulf %160, %10 : vector<8x32xf32>
    %162 = arith.addf %161, %11 : vector<8x32xf32>
    %cst_47 = arith.constant dense<0.000000e+00> : vector<8x32xf32>
    %163 = tpu.matmul %13, %162, %cst_47 {dimension_numbers = #tpu.dot_dimension_numbers<[1], [0], [0], [1], [0, 0, 1, 1], [], []>} : vector<8x8xf32>, vector<8x32xf32>, vector<8x32xf32> -> vector<8x32xf32>
    %164 = arith.addf %163, %12 : vector<8x32xf32>
    %165 = arith.addf %164, %134 : vector<8x32xf32>
    %c1 = arith.constant 1 : index
    %c0_48 = arith.constant 0 : index
    %c0_49 = arith.constant 0 : index
    %166 = vector.load %arg6[%c1, %c0_48, %c0_49] : memref<2x8x32xf32, #tpu.memory_space<vmem>>, vector<1x8x32xf32>
    %167 = vector.shape_cast %166 : vector<1x8x32xf32> to vector<8x32xf32>
    %168 = vector.shape_cast %165 : vector<8x32xf32> to vector<1x8x32xf32>
    tpu.vector_store %arg6[%c1, %c0_48, %c0_49], %168 {strides = array<i32>} : memref<2x8x32xf32, #tpu.memory_space<vmem>>, vector<1x8x32xf32>,
    return
  }
  func.func @transform_0(%arg0: i32) -> (i32, i32, i32) {
    %c0_i32 = arith.constant 0 : i32
    %c0_i32_0 = arith.constant 0 : i32
    %c0_i32_1 = arith.constant 0 : i32
    %c0_i32_2 = arith.constant 0 : i32
    return %c0_i32, %c0_i32_0, %c0_i32_1 : i32, i32, i32
  }
  func.func @transform_1(%arg0: i32) -> (i32, i32) {
    %c0_i32 = arith.constant 0 : i32
    %c0_i32_0 = arith.constant 0 : i32
    %c0_i32_1 = arith.constant 0 : i32
    return %c0_i32, %c0_i32_0 : i32, i32
  }
  func.func @transform_2(%arg0: i32) -> (i32, i32) {
    %c0_i32 = arith.constant 0 : i32
    %c0_i32_0 = arith.constant 0 : i32
    %c0_i32_1 = arith.constant 0 : i32
    return %c0_i32, %c0_i32_0 : i32, i32
  }
  func.func @transform_3(%arg0: i32) -> (i32, i32) {
    %c0_i32 = arith.constant 0 : i32
    %c0_i32_0 = arith.constant 0 : i32
    %c0_i32_1 = arith.constant 0 : i32
    return %c0_i32, %c0_i32_0 : i32, i32
  }
  func.func @transform_4(%arg0: i32) -> (i32, i32) {
    %c0_i32 = arith.constant 0 : i32
    %c0_i32_0 = arith.constant 0 : i32
    %c0_i32_1 = arith.constant 0 : i32
    return %c0_i32, %c0_i32_0 : i32, i32
  }
  func.func @transform_5(%arg0: i32) -> (i32, i32, i32) {
    %c0_i32 = arith.constant 0 : i32
    %c0_i32_0 = arith.constant 0 : i32
    %c0_i32_1 = arith.constant 0 : i32
    %c0_i32_2 = arith.constant 0 : i32
    return %c0_i32, %c0_i32_0, %c0_i32_1 : i32, i32, i32
  }
}

</mosaic_0001>

<bundles_post_ra>
// kernel: tpu_custom_call.1
= control target key start
LH: loop header
LB: loop body
LE: loop exit
PB: predicated region body
PF: predicated region fallthrough
CT: control target
= control target key end

     0   :  { %10 = vsyncpa [#allocation3], 0  ;;  %s1290_s0 = inlined_call_operand.hbm [shape: f32[2,8,32], index: 0, kind: input, shape index: {}]   ;;  %s1291_s1 = inlined_call_operand.hbm [shape: f32[32,160], index: 1, kind: input, shape index: {}]   ;;  %s1292_s2 = inlined_call_operand.vmem [shape: f32[1,192], index: 2, kind: input, shape index: {}]   ;;  %s1293_s3 = inlined_call_operand.hbm [shape: f32[24,32], index: 3, kind: input, shape index: {}]   ;;  %s1294_s4 = inlined_call_operand.hbm [shape: f32[8,8], index: 4, kind: input, shape index: {}]   ;;  %s1295_s5 = inlined_call_operand.hbm [shape: f32[2,8,32], index: 5, kind: output, shape index: {}]  }
   0x1   :  { %11 = vsyncpa [#allocation6], 0 }
   0x2   :  { %12 = vsyncpa [#allocation9], 0 }
   0x3   :  { %13 = vsyncpa [#allocation4], 0  ;;  %s1085_s18 = smov [#allocation5]  }
   0x4   :  { %s31_s19 = sshll.u32 %s1085_s18, 4  ;;  %s32_s19 = int_to_ptr.vmem [resolvable:$true] %s31_s19 }
   0x5   :  { %s985_s20 = scalar_lea.vmem %s32_s19, 1024  ;;  %p990_p1 = scmp.lt.s32.totalorder %s32_s19, %s32_s19 }
   0x6   :  { %p986_p0 = scmp.ne.s32.totalorder %s32_s19, %s985_s20  ;;  %p991_p2 = scmp.lt.s32.totalorder %s985_s20, %s985_s20 }
   0x8   :  { %p992_p3 = por %p991_p2, %p990_p1 }
   0xa   :  { %p993_p4 = pnand %p992_p3, %p986_p0 }
   0xc   :  { %996 = shalt.err (!%p993_p4)
}
   0xd   :  { %s1086_s21 = smov 256   ;;  %s1087_s22 = smov 16  }
   0xe   :  { %37 = dma.hbm_to_vmem [thread:$0]  %s1291_s1, 1024, %s32_s19, [#allocation6], %s1086_s21, %s1086_s21, %s1087_s22  }
   0xf   :  { %s1088_s25 = smov [#allocation2]  }
  0x10   :  { %s19_s26 = sshll.u32 %s1088_s25, 4  ;;  %s20_s26 = int_to_ptr.vmem [resolvable:$true] %s19_s26 }
  0x11   :  { %s1005_s27 = scalar_lea.vmem %s20_s26, 256  ;;  %p1010_p6 = scmp.lt.s32.totalorder %s20_s26, %s20_s26 }
  0x12   :  { %p1006_p5 = scmp.ne.s32.totalorder %s20_s26, %s1005_s27  ;;  %p1011_p7 = scmp.lt.s32.totalorder %s1005_s27, %s1005_s27 }
  0x14   :  { %p1012_p8 = por %p1011_p7, %p1010_p6 }
  0x16   :  { %p1013_p9 = pnand %p1012_p8, %p1006_p5 }
  0x18   :  { %1016 = shalt.err (!%p1013_p9)
}
  0x19   :  { %s1089_s28 = smov 128   ;;  %s1090_s29 = smov 8  }
  0x1a   :  { %25 = dma.hbm_to_vmem [thread:$0]  %s1290_s0, 256, %s20_s26, [#allocation3], %s1089_s28, %s1089_s28, %s1090_s29  }
  0x1b   :  { %s1091_s1 = smov [#allocation7]   ;;  %s1092_s8 = smov [#allocation8]  }
  0x1c   :  { %s45_s7 = sshll.u32 %s1091_s1, 4  ;;  %s58_s9 = sshll.u32 %s1092_s8, 4  ;;  %s46_s7 = int_to_ptr.vmem [resolvable:$true] %s45_s7  ;;  %s59_s9 = int_to_ptr.vmem [resolvable:$true] %s58_s9 }
  0x1d   :  { %s1025_s10 = scalar_lea.vmem %s46_s7, 384  ;;  %p1030_p11 = scmp.lt.s32.totalorder %s46_s7, %s46_s7 }
  0x1e   :  { %p1026_p10 = scmp.ne.s32.totalorder %s46_s7, %s1025_s10  ;;  %p1031_p12 = scmp.lt.s32.totalorder %s1025_s10, %s1025_s10 }
  0x20   :  { %p1032_p13 = por %p1031_p12, %p1030_p11 }
  0x22   :  { %p1033_p0 = pnand %p1032_p13, %p1026_p10 }
  0x24   :  { %1036 = shalt.err (!%p1033_p0)
}
  0x25   :  { %51 = dma.hbm_to_vmem [thread:$0]  %s1293_s3, 384, %s46_s7, [#allocation6], %s1089_s28, %s1089_s28, %s1090_s29  }
  0x26   :  { %s1045_s0 = scalar_lea.vmem %s59_s9, 128  ;;  %p1050_p2 = scmp.lt.s32.totalorder %s59_s9, %s59_s9 }
  0x27   :  { %p1046_p1 = scmp.ne.s32.totalorder %s59_s9, %s1045_s0  ;;  %p1051_p3 = scmp.lt.s32.totalorder %s1045_s0, %s1045_s0 }
  0x29   :  { %p1052_p4 = por %p1051_p3, %p1050_p2 }
  0x2b   :  { %p1053_p5 = pnand %p1052_p4, %p1046_p1 }
  0x2d   :  { %1056 = shalt.err (!%p1053_p5)
}
  0x2e   :  { %61 = dma.hbm_to_vmem [thread:$0]  %s1294_s4, 128, %s59_s9, [#allocation9]  }
  0x2f   :  { %1077 = dma.done.wait [#allocation3], 256  }
  0x30   :  { %1078 = vsyncadd [#allocation3], 4294967040 }
  0x31   :  { %1079 = dma.done.wait [#allocation6], 1408  }
  0x32   :  { %1080 = vsyncadd [#allocation6], 4294965888 }
  0x33   :  { %1081 = dma.done.wait [#allocation9], 128  }
  0x34   :  { %1082 = vsyncadd [#allocation9], 4294967168  ;;  %vm89_vm0 = vcmask 261120   ;;  %v1147_v0 = vld [vmem:[#allocation2] sm:$0xff]  ;;  %v1149_v1 = vld [vmem:[#allocation2 + $0x8] sm:$0xff]  ;;  %s1093_s15 = smov 96   ;;  %v119_v23 = vlaneseq }
  0x35   :  { %v90_v2 = vsel %vm89_vm0, %v1147_v0, 0.0  ;;  %v93_v3 = vsel %vm89_vm0, %v1149_v1, 0.0  ;;  %v1158_v4 = vld [vmem:[%s1292_s2] sm:$0x3]  ;;  %v78_v16 = vld [vmem:[#allocation5 + $0x20] sm:$0xff]  ;;  %s1094_s2 = smov 32  }
  0x36   :  { %91 = vadd.xlane.f32.xlu0 %v90_v2  ;;  %v80_v15 = vld [vmem:[#allocation5 + $0x30] sm:$0xff]  ;;  %v74_v18 = vld [vmem:[#allocation5] sm:$0xff]  ;;  %v120_v26 = vshrl.u32 %v119_v23, 7  ;;  %v118_v29 = vrot.slane %v1158_v4, 1  ;;  %v1169_v41 = vld [vmem:[#allocation5 + $0x38] sm:$0xff]  ;;  %s1095_s16 = smov 64  }
  0x37   :  { %878 = vmatprep.subr.mxu0 %v80_v15  ;;  %v76_v17 = vld [vmem:[#allocation5 + $0x10] sm:$0xff]  ;;  %889 = vmatprep.subr.mxu1 %v1169_v41  ;;  %v1173_v42 = vld [vmem:[#allocation5 + $0x28] sm:$0xff]  ;;  %v1176_v43 = vld [vmem:[#allocation5 + $0x18] sm:$0xff]  ;;  %v1096_v56 = vmov 0.0   ;;  %vm1097_vm1 = vmmov 0   ;;  %vm462_vm2 = vcmask 64512  }
  0x38   :  { %879 = vmatpush3.msra.mxu0 %v80_v15  ;;  %v121_v28 = vsub.s32 0, %v120_v26  ;;  %890 = vmatpush3.msra.mxu1 %v1169_v41  ;;  %v1181_v44 = vld [vmem:[#allocation5 + $0x8] sm:$0xff]  ;;  %s1098_s17 = smov [#allocation10]  }
  0x39   :  { %880 = vmatprep.subr.mxu0 %v78_v16  ;;  %891 = vmatprep.subr.mxu1 %v1173_v42  ;;  %s822_s18 = sshll.u32 %s1098_s17, 4  ;;  %s823_s18 = int_to_ptr.vmem [resolvable:$true] %s822_s18 }
  0x3a   :  { %94 = vadd.xlane.f32.xlu0 %v93_v3  ;;  %881 = vmatpush3.msra.mxu0 %v78_v16  ;;  %v122_v31 = vrot.slane %v118_v29, %v121_v28  ;;  %v139_v46 = vrot.slane %v1158_v4, %v121_v28  ;;  %s1057_s19 = scalar_lea.vmem %s823_s18, 256  ;;  %p1062_p7 = scmp.lt.s32.totalorder %s823_s18, %s823_s18 }
  0x3b   :  { %882 = vmatprep.subr.mxu0 %v76_v17  ;;  %892 = vmatpush3.msra.mxu1 %v1173_v42  ;;  %p1058_p6 = scmp.ne.s32.totalorder %s823_s18, %s1057_s19  ;;  %p1063_p8 = scmp.lt.s32.totalorder %s1057_s19, %s1057_s19 }
  0x3c   :  { %883 = vmatpush3.msra.mxu0 %v76_v17  ;;  %893 = vmatprep.subr.mxu1 %v1176_v43 }
  0x3d   :  { %884 = vmatprep.subr.mxu0 %v74_v18  ;;  %894 = vmatpush3.msra.mxu1 %v1176_v43  ;;  %p1064_p9 = por %p1063_p8, %p1062_p7 }
  0x3e   :  { %885 = vmatpush3.msra.mxu0 %v74_v18  ;;  %895 = vmatprep.subr.mxu1 %v1181_v44 }
  0x3f   :  { %896 = vmatpush3.msra.mxu1 %v1181_v44  ;;  %900 = vmatprep.subr.mxu0 %v1096_v56  ;;  %p1065_p10 = pnand %p1064_p9, %p1058_p6 }
  0x40   :  { %911 = vmatprep.subr.mxu1 %v1096_v56 }
  0x50   :  { %126 = vrot.lane.b32.xlu0 %v1158_v4, %s1093_s15 }
  0x54   :  { %347 = vrot.lane.b32.xlu0 %v78_v16, %s1094_s2 }
  0xbf   :  { %v92_v5 = vpop.xlane.xlu0 %91 }
  0xc0   :  { %v97_v6 = vmul.f32 0.03125, %v92_v5 }
  0xc2   :  { %v99_v7 = vsub.f32 %v1147_v0, %v97_v6 }
  0xc3   :  { %v95_v8 = vpop.xlane.xlu0 %94 }
  0xc4   :  { %v98_v9 = vmul.f32 0.03125, %v95_v8  ;;  %v101_v10 = vmul.f32 %v99_v7, %v99_v7 }
  0xc6   :  { %v100_v11 = vsub.f32 %v1149_v1, %v98_v9  ;;  %v103_v12 = vsel %vm89_vm0, %v101_v10, 0.0 }
  0xc7   :  { %104 = vadd.xlane.f32.xlu1 %v103_v12  ;;  %v127_v27 = vpop.permute.xlu0 %126 }
  0xc8   :  { %v102_v13 = vmul.f32 %v100_v11, %v100_v11  ;;  %v128_v30 = vrot.slane %v127_v27, 1 }
  0xca   :  { %v106_v14 = vsel %vm89_vm0, %v102_v13, 0.0  ;;  %v132_v33 = vrot.slane %v128_v30, %v121_v28 }
  0xcb   :  { %107 = vadd.xlane.f32.xlu1 %v106_v14  ;;  %v348_v54 = vpop.permute.xlu0 %347 }
 0x150   :  { %v105_v19 = vpop.xlane.xlu1 %104 }
 0x151   :  { %v109_v20 = vmul.f32 0.03125, %v105_v19 }
 0x153   :  { %v111_v21 = vadd.f32 1e-06, %v109_v20 }
 0x154   :  { %v108_v22 = vpop.xlane.xlu1 %107 }
 0x155   :  { %957 = vrsqrt.f32 %v111_v21  ;;  %v110_v24 = vmul.f32 0.03125, %v108_v22 }
 0x157   :  { %v112_v25 = vadd.f32 1e-06, %v110_v24 }
 0x159   :  { %959 = vrsqrt.f32 %v112_v25 }
 0x162   :  { %v958_v32 = vpop.eup %957 }
 0x163   :  { %v115_v34 = vmul.f32 %v958_v32, %v99_v7 }
 0x165   :  { %v124_v35 = vmul.f32 %v122_v31, %v115_v34 }
 0x166   :  { %v960_v36 = vpop.eup %959 }
 0x167   :  { %v116_v37 = vmul.f32 %v960_v36, %v100_v11  ;;  %v134_v38 = vadd.f32 %v132_v33, %v124_v35 }
 0x169   :  { %v125_v39 = vmul.f32 %v122_v31, %v116_v37  ;;  %886 = vmatprep.mubr.msk.f32.mxu0 %vm89_vm0, %v134_v38 }
 0x16b   :  { %v135_v40 = vadd.f32 %v132_v33, %v125_v39 }
 0x16d   :  { %887 = vmatmul.mubr.msk.f32.vlgmr.msra.gmra.mxu0 %vm89_vm0, %v135_v40 }
 0x16e   :  { %908 = vmatprep.mubr.msk.f32.mxu0 %vm1097_vm1, %v1096_v56 }
 0x22d   :  { %v888_v45 = vpop.f32.mrf.mxu0 }
 0x22e   :  { %v1187_v49 = vadd.f32 %v888_v45, %v139_v46 }
 0x22f   :  { %v213_v47 = vpop.f32.mrf.mxu0 }
 0x230   :  { %v214_v48 = vadd.f32 %v213_v47, %v139_v46 }
 0x232   :  { %328 = vrot.lane.b32.xlu0 %v214_v48, %s1095_s16  ;;  %224 = vrot.lane.b32.xlu1 %v214_v48, %s1093_s15 }
 0x236   :  { %226 = vrot.lane.b32.xlu1 %v1187_v49, %s1093_s15  ;;  %343 = vrot.lane.b32.xlu0 %v74_v18, %s1094_s2 }
 0x23a   :  { %349 = vrot.lane.b32.xlu1 %v80_v15, %s1094_s2 }
 0x23e   :  { %330 = vrot.lane.b32.xlu1 %v1187_v49, %s1095_s16 }
 0x242   :  { %345 = vrot.lane.b32.xlu1 %v76_v17, %s1094_s2 }
 0x246   :  { %355 = vrot.lane.b32.xlu1 %v139_v46, %s1094_s2 }
 0x2a4   :  { %v1192_v50 = vpop.permute.xlu1 %224  ;;  %v1202_v57 = vpop.permute.xlu0 %328 }
 0x2a5   :  { %v230_v51 = vmul.f32 %v1192_v50, %v214_v48 }
 0x2a7   :  { %897 = vmatprep.mubr.msk.f32.mxu1 %vm89_vm0, %v230_v51 }
 0x2a8   :  { %v1196_v52 = vpop.permute.xlu1 %226  ;;  %v344_v60 = vpop.permute.xlu0 %343 }
 0x2a9   :  { %v231_v53 = vmul.f32 %v1196_v52, %v214_v48 }
 0x2ab   :  { %898 = vmatmul.mubr.msk.f32.vlgmr.msra.gmra.mxu1 %vm89_vm0, %v231_v53 }
 0x2ac   :  { %v350_v55 = vpop.permute.xlu1 %349  ;;  %913 = vmatprep.mubr.msk.f32.mxu1 %vm1097_vm1, %v1096_v56 }
 0x2ad   :  { %901 = vmatpush3.msra.mxu0 %v350_v55 }
 0x2ae   :  { %902 = vmatprep.subr.mxu0 %v1096_v56 }
 0x2af   :  { %903 = vmatpush3.msra.mxu0 %v348_v54 }
 0x2b0   :  { %v1204_v58 = vpop.permute.xlu1 %330  ;;  %904 = vmatprep.subr.mxu0 %v1096_v56 }
 0x2b4   :  { %v346_v59 = vpop.permute.xlu1 %345 }
 0x2b5   :  { %905 = vmatpush3.msra.mxu0 %v346_v59 }
 0x2b6   :  { %906 = vmatprep.subr.mxu0 %v1096_v56 }
 0x2b7   :  { %907 = vmatpush3.msra.mxu0 %v344_v60 }
 0x2b8   :  { %927 = vmatprep.subr.mxu0 %v1096_v56  ;;  %v1228_v21 = vpop.permute.xlu1 %355 }
 0x36b   :  { %v899_v61 = vpop.f32.mrf.mxu1 }
 0x36c   :  { %v314_v63 = vsel %vm89_vm0, %v899_v61, -inf }
 0x36d   :  { %v304_v62 = vpop.f32.mrf.mxu1 }
 0x36e   :  { %v313_v2 = vsel %vm89_vm0, %v304_v62, -inf }
 0x36f   :  { %v315_v3 = vmax.f32 %v313_v2, %v314_v63  ;;  %v1240_v2 = vld [vmem:[#allocation8] sm:$0xff] }
 0x371   :  { %v316_v4 = vsub.f32 %v304_v62, %v315_v3  ;;  %v317_v5 = vsub.f32 %v899_v61, %v315_v3  ;;  %v1236_v61 = vld [vmem:[#allocation7 + $0x8] sm:$0xff]  ;;  %v538_v3 = vmul.f32 %v1192_v50, %v1187_v49  ;;  %v539_v50 = vmul.f32 %v1196_v52, %v1187_v49 }
 0x373   :  { %v318_v6 = vmul.f32 1.442695, %v316_v4  ;;  %v320_v7 = vmul.f32 1.442695, %v317_v5 }
 0x375   :  { %961 = vpow2.f32 %v318_v6 }
 0x376   :  { %963 = vpow2.f32 %v320_v7 }
 0x382   :  { %v962_v8 = vpop.eup %961 }
 0x383   :  { %v964_v9 = vpop.eup %963  ;;  %v322_v10 = vsel %vm89_vm0, %v962_v8, 0.0 }
 0x384   :  { %v323_v11 = vsel %vm89_vm0, %v964_v9, 0.0 }
 0x385   :  { %v324_v12 = vadd.f32 %v323_v11, %v322_v10 }
 0x387   :  { %965 = vrcp.f32 %v324_v12 }
 0x394   :  { %v966_v13 = vpop.eup %965 }
 0x395   :  { %v326_v14 = vmul.f32 %v966_v13, %v962_v8  ;;  %v327_v15 = vmul.f32 %v966_v13, %v964_v9 }
 0x397   :  { %v334_v16 = vmul.f32 %v1202_v57, %v326_v14  ;;  %v335_v17 = vmul.f32 %v1204_v58, %v327_v15 }
 0x399   :  { %v336_v18 = vsel %vm89_vm0, %v334_v16, 0.0  ;;  %v337_v19 = vsel %vm89_vm0, %v335_v17, 0.0 }
 0x39a   :  { %v338_v20 = vadd.f32 %v337_v19, %v336_v18 }
 0x39c   :  { %909 = vmatmul.mubr.msk.f32.vlgmr.msra.gmra.mxu0 %vm89_vm0, %v338_v20 }
 0x39d   :  { %928 = vmatpush3.msra.mxu0 %v350_v55  ;;  %935 = vmatprep.mubr.msk.f32.mxu0 %vm1097_vm1, %v1096_v56 }
 0x39e   :  { %929 = vmatprep.subr.mxu0 %v1096_v56 }
 0x39f   :  { %930 = vmatpush3.msra.mxu0 %v348_v54 }
 0x3a0   :  { %931 = vmatprep.subr.mxu0 %v1096_v56 }
 0x3a1   :  { %932 = vmatpush3.msra.mxu0 %v346_v59  ;;  %v1234_v59 = vld [vmem:[#allocation7] sm:$0xff] }
 0x3a2   :  { %933 = vmatprep.subr.mxu0 %v1096_v56 }
 0x3a3   :  { %934 = vmatpush3.msra.mxu0 %v344_v60 }
 0x45c   :  { %v427_v22 = vpop.f32.mrf.mxu0 }
 0x45d   :  { %v428_v23 = vadd.f32 %v427_v22, %v1228_v21 }
 0x45e   :  { %v910_v24 = vpop.f32.mrf.mxu0 }
 0x45f   :  { %v431_v25 = vadd.f32 %v428_v23, %v1147_v0 }
 0x461   :  { %v432_v26 = vsel %vm89_vm0, %v431_v25, 0.0 }
 0x462   :  { %433 = vadd.xlane.f32.xlu0 %v432_v26 }
 0x4eb   :  { %v434_v27 = vpop.xlane.xlu0 %433 }
 0x4ec   :  { %v435_v28 = vmul.f32 0.03125, %v434_v27 }
 0x4ee   :  { %v436_v29 = vrot.slane %v435_v28, 4 }
 0x4f0   :  { %v437_v30 = vadd.f32 %v436_v29, %v435_v28 }
 0x4f2   :  { %v438_v31 = vrot.slane %v437_v30, 2 }
 0x4f4   :  { %v439_v32 = vadd.f32 %v438_v31, %v437_v30 }
 0x4f6   :  { %v440_v33 = vrot.slane %v439_v32, 1 }
 0x4f8   :  { %v441_v34 = vadd.f32 %v440_v33, %v439_v32 }
 0x4fa   :  { %v443_v35 = vmul.f32 0.125, %v441_v34 }
 0x4fc   :  { %v444_v36 = vsub.f32 %v431_v25, %v443_v35 }
 0x4fe   :  { %v445_v37 = vmul.f32 %v444_v36, %v444_v36 }
 0x500   :  { %v446_v38 = vsel %vm89_vm0, %v445_v37, 0.0 }
 0x501   :  { %447 = vadd.xlane.f32.xlu1 %v446_v38 }
 0x58a   :  { %v448_v39 = vpop.xlane.xlu1 %447 }
 0x58b   :  { %v449_v40 = vmul.f32 0.03125, %v448_v39 }
 0x58d   :  { %v450_v0 = vrot.slane %v449_v40, 4 }
 0x58f   :  { %v451_v45 = vadd.f32 %v450_v0, %v449_v40 }
 0x591   :  { %v452_v46 = vrot.slane %v451_v45, 2 }
 0x593   :  { %v453_v47 = vadd.f32 %v452_v46, %v451_v45 }
 0x595   :  { %v454_v48 = vrot.slane %v453_v47, 1 }
 0x597   :  { %v455_v51 = vadd.f32 %v454_v48, %v453_v47 }
 0x599   :  { %v456_v53 = vmul.f32 0.125, %v455_v51 }
 0x59b   :  { %v457_v54 = vadd.f32 1e-06, %v456_v53 }
 0x59d   :  { %967 = vrsqrt.f32 %v457_v54 }
 0x5aa   :  { %v968_v55 = vpop.eup %967 }
 0x5ab   :  { %v459_v60 = vmul.f32 %v968_v55, %v444_v36 }
 0x5ad   :  { %v460_v62 = vmul.f32 %v459_v60, %v1234_v59 }
 0x5af   :  { %v461_v63 = vadd.f32 %v460_v62, %v1236_v61 }
 0x5b1   :  { %912 = vmatpush3.msra.mxu1 %v461_v63 }
 0x5b2   :  { %914 = vmatmul.mubr.msk.f32.vlgmr.msra.gmra.mxu1 %vm462_vm2, %v1240_v2  ;;  %916 = vmatprep.subr.mxu1 %v1169_v41 }
 0x5b3   :  { %917 = vmatpush3.msra.mxu1 %v1169_v41  ;;  %924 = vmatprep.mubr.msk.f32.mxu1 %vm89_vm0, %v538_v3  ;;  %v1261_v41 = vld [vmem:[#allocation7 + $0x10] sm:$0xff] }
 0x5b4   :  { %918 = vmatprep.subr.mxu1 %v1173_v42 }
 0x5b5   :  { %919 = vmatpush3.msra.mxu1 %v1173_v42 }
 0x5b6   :  { %920 = vmatprep.subr.mxu1 %v1176_v43 }
 0x5b7   :  { %921 = vmatpush3.msra.mxu1 %v1176_v43 }
 0x5b8   :  { %922 = vmatprep.subr.mxu1 %v1181_v44 }
 0x5b9   :  { %923 = vmatpush3.msra.mxu1 %v1181_v44 }
 0x5ba   :  { %925 = vmatmul.mubr.msk.f32.vlgmr.msra.gmra.mxu1 %vm89_vm0, %v539_v50  ;;  %938 = vmatprep.subr.mxu1 %v1096_v56 }
 0x5bb   :  { %940 = vmatprep.mubr.msk.f32.mxu1 %vm1097_vm1, %v1096_v56 }
 0x672   :  { %v532_v42 = vpop.f32.mrf.mxu1 }
 0x673   :  { %v533_v4 = vadd.f32 %v532_v42, %v1261_v41 }
 0x674   :  { %v915_v43 = vpop.f32.mrf.mxu1 }
 0x675   :  { %v536_v5 = vadd.f32 %v533_v4, %v431_v25 }
 0x677   :  { %537 = vst.msk [vmem:[#allocation10] sm:$0xff] %vm89_vm0, %v536_v5 }
 0x67a   :  { %v926_v49 = vpop.f32.mrf.mxu1 }
 0x67b   :  { %v622_v44 = vsel %vm89_vm0, %v926_v49, -inf }
 0x67c   :  { %v612_v52 = vpop.f32.mrf.mxu1 }
 0x67d   :  { %v621_v6 = vsel %vm89_vm0, %v612_v52, -inf }
 0x67e   :  { %v623_v7 = vmax.f32 %v621_v6, %v622_v44 }
 0x680   :  { %v624_v8 = vsub.f32 %v612_v52, %v623_v7  ;;  %v625_v9 = vsub.f32 %v926_v49, %v623_v7 }
 0x682   :  { %v626_v10 = vmul.f32 1.442695, %v624_v8  ;;  %v628_v56 = vmul.f32 1.442695, %v625_v9 }
 0x684   :  { %969 = vpow2.f32 %v626_v10 }
 0x685   :  { %971 = vpow2.f32 %v628_v56 }
 0x691   :  { %v970_v11 = vpop.eup %969 }
 0x692   :  { %v972_v12 = vpop.eup %971  ;;  %v630_v13 = vsel %vm89_vm0, %v970_v11, 0.0 }
 0x693   :  { %v631_v14 = vsel %vm89_vm0, %v972_v12, 0.0 }
 0x694   :  { %v632_v15 = vadd.f32 %v631_v14, %v630_v13 }
 0x696   :  { %973 = vrcp.f32 %v632_v15 }
 0x6a3   :  { %v974_v16 = vpop.eup %973 }
 0x6a4   :  { %v634_v17 = vmul.f32 %v974_v16, %v970_v11  ;;  %v635_v18 = vmul.f32 %v974_v16, %v972_v12 }
 0x6a6   :  { %v636_v19 = vmul.f32 %v634_v17, %v1202_v57  ;;  %v637_v20 = vmul.f32 %v635_v18, %v1204_v58 }
 0x6a8   :  { %v638_v22 = vsel %vm89_vm0, %v636_v19, 0.0  ;;  %v639_v23 = vsel %vm89_vm0, %v637_v20, 0.0 }
 0x6a9   :  { %v640_v24 = vadd.f32 %v639_v23, %v638_v22 }
 0x6ab   :  { %936 = vmatmul.mubr.msk.f32.vlgmr.msra.gmra.mxu0 %vm89_vm0, %v640_v24 }
 0x76b   :  { %v710_v25 = vpop.f32.mrf.mxu0 }
 0x76c   :  { %v711_v26 = vadd.f32 %v710_v25, %v1228_v21 }
 0x76d   :  { %v937_v27 = vpop.f32.mrf.mxu0 }
 0x76e   :  { %v714_v28 = vadd.f32 %v711_v26, %v1149_v1 }
 0x770   :  { %v715_v29 = vsel %vm89_vm0, %v714_v28, 0.0 }
 0x771   :  { %716 = vadd.xlane.f32.xlu0 %v715_v29 }
 0x7fa   :  { %v717_v30 = vpop.xlane.xlu0 %716 }
 0x7fb   :  { %v718_v57 = vmul.f32 0.03125, %v717_v30 }
 0x7fd   :  { %v719_v31 = vrot.slane %v718_v57, 4 }
 0x7ff   :  { %v720_v58 = vadd.f32 %v719_v31, %v718_v57 }
 0x801   :  { %v721_v32 = vrot.slane %v720_v58, 2 }
 0x803   :  { %v722_v33 = vadd.f32 %v721_v32, %v720_v58 }
 0x805   :  { %v723_v34 = vrot.slane %v722_v33, 1 }
 0x807   :  { %v724_v35 = vadd.f32 %v723_v34, %v722_v33 }
 0x809   :  { %v725_v36 = vmul.f32 0.125, %v724_v35 }
 0x80b   :  { %v726_v37 = vsub.f32 %v714_v28, %v725_v36 }
 0x80d   :  { %v727_v38 = vmul.f32 %v726_v37, %v726_v37 }
 0x80f   :  { %v728_v39 = vsel %vm89_vm0, %v727_v38, 0.0 }
 0x810   :  { %729 = vadd.xlane.f32.xlu0 %v728_v39 }
 0x899   :  { %v730_v21 = vpop.xlane.xlu0 %729 }
 0x89a   :  { %v731_v40 = vmul.f32 0.03125, %v730_v21 }
 0x89c   :  { %v732_v1 = vrot.slane %v731_v40, 4 }
 0x89e   :  { %v733_v0 = vadd.f32 %v732_v1, %v731_v40 }
 0x8a0   :  { %v734_v45 = vrot.slane %v733_v0, 2 }
 0x8a2   :  { %v735_v46 = vadd.f32 %v734_v45, %v733_v0 }
 0x8a4   :  { %v736_v47 = vrot.slane %v735_v46, 1 }
 0x8a6   :  { %v737_v48 = vadd.f32 %v736_v47, %v735_v46 }
 0x8a8   :  { %v738_v51 = vmul.f32 0.125, %v737_v48 }
 0x8aa   :  { %v739_v53 = vadd.f32 1e-06, %v738_v51 }
 0x8ac   :  { %975 = vrsqrt.f32 %v739_v53 }
 0x8b9   :  { %v976_v54 = vpop.eup %975 }
 0x8ba   :  { %v741_v55 = vmul.f32 %v976_v54, %v726_v37 }
 0x8bc   :  { %v742_v60 = vmul.f32 %v741_v55, %v1234_v59 }
 0x8be   :  { %v743_v62 = vadd.f32 %v742_v60, %v1236_v61 }
 0x8c0   :  { %939 = vmatpush3.msra.mxu1 %v743_v62 }
 0x8c1   :  { %941 = vmatmul.mubr.msk.f32.vlgmr.msra.gmra.mxu1 %vm462_vm2, %v1240_v2 }
 0x981   :  { %v810_v63 = vpop.f32.mrf.mxu1 }
 0x982   :  { %v811_v3 = vadd.f32 %v810_v63, %v1261_v41 }
 0x983   :  { %v942_v50 = vpop.f32.mrf.mxu1 }
 0x984   :  { %v814_v42 = vadd.f32 %v811_v3, %v714_v28 }
 0x986   :  { %816 = vst.msk [vmem:[#allocation10 + $0x8] sm:$0xff] %vm89_vm0, %v814_v42 }
 0x987   :  { %1068 = shalt.err (!%p1065_p10)
}
 0x988   :  { %828 = dma.vmem_to_hbm [thread:$0]  %s823_s18, 256, %s1295_s5, [#allocation4], %s1089_s28, %s1089_s28, %s1090_s29  }
 0x989   :  { %1083 = dma.done.wait [#allocation4], 256  }
 0x98a   :  { %1084 = vsyncadd [#allocation4], 4294967040 }
 0x98b   :  { %832 = vsyncpa [#allocation3], 1 }
 0x98c   :  { %833 = vsyncpa [#allocation6], 1 }
 0x98d   :  { %834 = vsyncpa [#allocation9], 1 }
 0x98e   :  { %835 = vsyncpa [#allocation4], 1 }

</bundles_post_ra>
